<compile_context>
chip_gen: v7x
topology: tpu7x:2x2x1
jax: 0.10.0
libtpu: 0.0.40
codegen_flags: <defaults>
</compile_context>

<pallas_src>
import jax
import jax.numpy as jnp
from jax.experimental import pallas as pl
from jax.experimental.pallas import tpu as pltpu


def _round_up(x, m):
    return ((x + m - 1) // m) * m


# ---------------------------------------------------------------------------
# Pallas kernel: fused 3x3 conv (stride 1, pad 1) + bias + ReLU on a
# (row-tile, Cout-tile) output block.
# ---------------------------------------------------------------------------
def repvgg_kernel(x_main_ref, x_halo_ref, w_ref, b_ref, o_ref):
    # x_main_ref: (1, TH, Wp, Cin)   padded rows [h*TH, h*TH+TH)
    # x_halo_ref: (1, 8,  Wp, Cin)   padded rows [h*TH+TH, h*TH+TH+8); first 2 used
    # w_ref:      (3, 3, Cin, TN)    fused weight tile, (ky, kx, ci, co)
    # b_ref:      (1, TN)            fused bias tile (f32)
    # o_ref:      (1, TH, W, TN)     output block
    _, TH, Wp, Cin = x_main_ref.shape
    _, _, W, TN = o_ref.shape
    Ws = Wp - 8                       # matmul column width: multiple of 8, >= W
    f32 = jnp.float32

    # Assemble the (TH+2)-row slab once: row halo stitched on the leading axis
    # (single contiguous materialization; no per-tap copies, no lane concat).
    main = x_main_ref[0, :, :, :]                          # (TH, Wp, Cin)
    halo = x_halo_ref[0, 0:2, :, :]                        # (2,  Wp, Cin)
    slab = jnp.concatenate([main, halo], axis=0)           # (TH+2, Wp, Cin)

    w_all = w_ref[...]                                     # (3, 3, Cin, TN)

    # 9 accumulating MXU dots with K = Cin.
    #  * dx shift: 3 column-sliced views of the slab (dx=0 aligned/free,
    #    dx=1,2 cost one sublane shift each — far less than 9 materialized
    #    im2col slices + a 9-way lane concatenate).
    #  * dy offset: leading-axis slice of the dx view -> free.
    #  * The right-hand zero-pad columns ride through the matmul and are
    #    dropped once in the f32 epilogue.
    acc = None
    for dx in range(3):
        sl = slab[:, dx:dx + Ws, :]                        # (TH+2, Ws, Cin)
        for dy in range(3):
            lhs = sl[dy:dy + TH].reshape(TH * Ws, Cin)     # free relabel (Ws % 8 == 0)
            part = jnp.dot(lhs, w_all[dy, dx], preferred_element_type=f32)
            acc = part if acc is None else acc + part      # (TH*Ws, TN) f32

    # f32 epilogue: drop pad columns, add bias, ReLU, cast, store.
    res = acc.reshape(TH, Ws, TN)[:, :W, :]
    res = jnp.maximum(res + b_ref[...].reshape(1, 1, TN), 0.0)
    o_ref[0] = res.astype(o_ref.dtype)


# ---------------------------------------------------------------------------
# Tiling helpers
# ---------------------------------------------------------------------------
def _pick_row_tile(H, W, requested=None):
    """Largest multiple-of-8 divisor of H with a bounded matmul M (= TH*Ws)."""
    if requested is not None:
        assert requested % 8 == 0 and H % requested == 0, \
            "row_tile must be a multiple of 8 that divides H"
        return requested
    assert H % 8 == 0, "H must be a multiple of 8"  # TODO(synk): masked last tile
    cands = [th for th in range(8, H + 1, 8) if H % th == 0]
    ws = _round_up(W, 8)
    good = [th for th in cands if th * ws <= 2048]  # bound acc / vreg pressure
    return max(good) if good else min(cands)


def _pick_cout_tile(Cout):
    for tn in (256, 128):       # lane-dense stores, bounded weight block VMEM
        if Cout % tn == 0:
            return tn
    return Cout                 # small Cout: single (lane-sparse) tile


# ---------------------------------------------------------------------------
# Wrappers
# ---------------------------------------------------------------------------
def repvgg_block_forward_nhwc(x_nhwc, w_eq, b_eq, *, row_tile=None,
                              compute_dtype=None, out_dtype=None):
    """Channels-last entry point. x_nhwc: (N,H,W,Cin); w_eq OIHW; b_eq (Cout,)."""
    N, H, W, Cin = x_nhwc.shape
    Cout = w_eq.shape[0]
    TH = _pick_row_tile(H, W, row_tile)
    TN = _pick_cout_tile(Cout)
    nh = H // TH
    nc = Cout // TN
    thb = TH // 8

    Ws = _round_up(W, 8)        # matmul column width carried through the dots
    Wp = Ws + 8                 # padded width (1 left zero col + right zero cols)

    cdtype = compute_dtype if compute_dtype is not None else x_nhwc.dtype
    odtype = out_dtype if out_dtype is not None else x_nhwc.dtype

    # One HBM-side zero pad: 1 top row + 7 bottom rows (room for the 8-row
    # halo block), 1 left col + (Wp-W-1) right cols.  Row blocks and the halo
    # block are then plain Blocked specs — no overlapping windows needed.
    x = x_nhwc.astype(cdtype)
    x_pad = jnp.pad(x, ((0, 0), (1, 7), (1, Wp - W - 1), (0, 0)))

    # Fused weight in (ky, kx, ci, co) layout so w[dy, dx] is a free slice.
    w = jnp.transpose(w_eq, (2, 3, 1, 0)).astype(cdtype)          # (3,3,Cin,Cout)
    b = b_eq.reshape(1, Cout).astype(jnp.float32)

    # VMEM budget: double-buffered in/out blocks + weight tile + in-kernel
    # temporaries (slab, 3 dx views, f32 acc), clamped to [32 MiB, 64 MiB].
    cb = jnp.dtype(cdtype).itemsize
    ob = jnp.dtype(odtype).itemsize
    in_blk = (TH + 8) * Wp * Cin * cb
    out_blk = TH * W * TN * ob
    w_blk = 9 * Cin * TN * cb + TN * 4
    tmp = 5 * (TH + 2) * Wp * Cin * cb + 2 * TH * Ws * TN * 4
    vmem_limit = int(min(64 << 20,
                         max(32 << 20,
                             2 * in_blk + 2 * out_blk + w_blk + tmp + (4 << 20))))

    return pl.pallas_call(
        repvgg_kernel,
        out_shape=jax.ShapeDtypeStruct((N, H, W, Cout), odtype),
        grid_spec=pltpu.PrefetchScalarGridSpec(
            num_scalar_prefetch=0,
            grid=(N, nh, nc),
            in_specs=[
                # main row block: padded rows [h*TH, h*TH+TH)
                pl.BlockSpec((1, TH, Wp, Cin), lambda n, h, c: (n, h, 0, 0)),
                # halo row block: padded rows [h*TH+TH, h*TH+TH+8)
                pl.BlockSpec((1, 8, Wp, Cin),
                             lambda n, h, c: (n, (h + 1) * thb, 0, 0)),
                # weight / bias tiles along Cout
                pl.BlockSpec((3, 3, Cin, TN), lambda n, h, c: (0, 0, 0, c)),
                pl.BlockSpec((1, TN), lambda n, h, c: (0, c)),
            ],
            out_specs=pl.BlockSpec((1, TH, W, TN), lambda n, h, c: (n, h, 0, c)),
        ),
        compiler_params=pltpu.CompilerParams(
            dimension_semantics=("parallel", "parallel", "parallel"),
            vmem_limit_bytes=vmem_limit),
    )(x_pad, x_pad, w, b)


def repvgg_block_forward(x_nchw, w_eq, b_eq, *, row_tile=None,
                         compute_dtype=None, out_dtype=None):
    """NCHW wrapper for PyTorch-layout parity.  In a real model keep NHWC end
    to end and call repvgg_block_forward_nhwc directly (the two transposes are
    pure layout glue)."""
    x_nhwc = jnp.transpose(x_nchw, (0, 2, 3, 1))
    y = repvgg_block_forward_nhwc(x_nhwc, w_eq, b_eq, row_tile=row_tile,
                                  compute_dtype=compute_dtype,
                                  out_dtype=out_dtype)
    return jnp.transpose(y, (0, 3, 1, 2))


# ---------------------------------------------------------------------------
# Parameter setup: deterministic init + RepVGG branch fusion (plain-JAX glue)
# ---------------------------------------------------------------------------
def fuse_conv_bn(kernel, gamma, beta, mean, var, eps=1e-5):
    std = jnp.sqrt(var + eps)
    t = (gamma / std).reshape(-1, 1, 1, 1)
    return kernel * t, beta - mean * gamma / std


def make_params(key, in_channels, out_channels):
    ks = jax.random.split(key, 14)
    f32 = jnp.float32

    def bn_params(k0, k1, k2, k3, C):
        gamma = jax.random.uniform(k0, (C,), f32, 0.5, 1.5)
        beta = jax.random.normal(k1, (C,), f32) * 0.1
        mean = jax.random.normal(k2, (C,), f32) * 0.1
        var = jax.random.uniform(k3, (C,), f32, 0.5, 1.5)
        return gamma, beta, mean, var

    # rbr_dense: conv3x3 (no bias) + BN
    w3 = jax.random.normal(ks[0], (out_channels, in_channels, 3, 3), f32) * 0.1
    bn3 = bn_params(ks[1], ks[2], ks[3], ks[4], out_channels)
    # rbr_1x1: conv1x1 (no bias) + BN
    w1 = jax.random.normal(ks[5], (out_channels, in_channels, 1, 1), f32) * 0.1
    bn1 = bn_params(ks[6], ks[7], ks[8], ks[9], out_channels)
    # rbr_identity: BN only (exists since in_channels == out_channels, stride=1)
    bni = bn_params(ks[10], ks[11], ks[12], ks[13], in_channels)

    # --- get_equivalent_kernel_bias ---
    k3f, b3f = fuse_conv_bn(w3, *bn3)
    k1f, b1f = fuse_conv_bn(w1, *bn1)
    k1f_pad = jnp.pad(k1f, ((0, 0), (0, 0), (1, 1), (1, 1)))        # 1x1 -> 3x3
    id_tensor = jnp.zeros((in_channels, in_channels, 3, 3), f32)
    id_tensor = id_tensor.at[jnp.arange(in_channels),
                             jnp.arange(in_channels), 1, 1].set(1.0)
    kif, bif = fuse_conv_bn(id_tensor, *bni)

    w_eq = k3f + k1f_pad + kif
    b_eq = b3f + b1f + bif
    return w_eq, b_eq


def reference_forward(x_nchw, w_eq, b_eq):
    """Pure-JAX reference of the fused conv3x3 + bias + ReLU (NCHW)."""
    y = jax.lax.conv_general_dilated(
        x_nchw, w_eq, window_strides=(1, 1), padding=((1, 1), (1, 1)),
        dimension_numbers=("NCHW", "OIHW", "NCHW"))
    y = y + b_eq.reshape(1, -1, 1, 1)
    return jnp.maximum(y, 0.0)


if __name__ == "__main__":
    key = jax.random.PRNGKey(0)
    kx, kp = jax.random.split(key)

    N, C, H, W = 2, 4, 16, 16   # in_channels == out_channels, stride=1, pad=1
    x = jax.random.normal(kx, (N, C, H, W), jnp.float32)
    w_eq, b_eq = make_params(kp, C, C)

    # row_tile=8 -> 2 row tiles per image: exercises the halo-block stitching
    # and the multi-row-tile index maps.
    out = repvgg_block_forward(x, w_eq, b_eq, row_tile=8)
    out = jax.block_until_ready(out)

    ref = reference_forward(x, w_eq, b_eq)
    assert out.shape == (N, C, H, W)
    assert jnp.allclose(out, ref, atol=1e-4, rtol=1e-4), "mismatch vs reference"

    print("KERNEL_OK")
</pallas_src>

<mosaic_0001>
module attributes {stable_mosaic.version = 11 : i64} {
  func.func @repvgg_kernel(%arg0: i32, %arg1: i32, %arg2: i32, %arg3: memref<1x8x24x4xf32, #tpu.memory_space<vmem>>, %arg4: memref<1x8x24x4xf32, #tpu.memory_space<vmem>>, %arg5: memref<3x3x4x4xf32, #tpu.memory_space<vmem>>, %arg6: memref<1x4xf32, #tpu.memory_space<vmem>>, %arg7: memref<1x8x16x4xf32, #tpu.memory_space<vmem>>) attributes {dimension_semantics = [#tpu.dimension_semantics<parallel>, #tpu.dimension_semantics<parallel>, #tpu.dimension_semantics<parallel>], iteration_bounds = array<i64: 2, 2, 1>, scalar_prefetch = 0 : i64, scratch_operands = 0 : i64, tpu.core_type = #tpu.core_type<tc>, window_params = [{transform_indices = @transform_0, window_bounds = array<i64: 1, 8, 24, 4>}, {transform_indices = @transform_1, window_bounds = array<i64: 1, 8, 24, 4>}, {transform_indices = @transform_2, window_bounds = array<i64: 3, 3, 4, 4>}, {transform_indices = @transform_3, window_bounds = array<i64: 1, 4>}, {transform_indices = @transform_4, window_bounds = array<i64: 1, 8, 16, 4>}]} {
    %c0 = arith.constant 0 : index
    %c0_0 = arith.constant 0 : index
    %c0_1 = arith.constant 0 : index
    %c0_2 = arith.constant 0 : index
    %0 = vector.load %arg3[%c0, %c0_0, %c0_1, %c0_2] : memref<1x8x24x4xf32, #tpu.memory_space<vmem>>, vector<1x8x24x4xf32>
    %1 = vector.shape_cast %0 : vector<1x8x24x4xf32> to vector<8x24x4xf32>
    %c0_3 = arith.constant 0 : index
    %c0_4 = arith.constant 0 : index
    %c0_5 = arith.constant 0 : index
    %c0_6 = arith.constant 0 : index
    %2 = vector.load %arg4[%c0_3, %c0_4, %c0_5, %c0_6] : memref<1x8x24x4xf32, #tpu.memory_space<vmem>>, vector<1x2x24x4xf32>
    %3 = vector.shape_cast %2 : vector<1x2x24x4xf32> to vector<2x24x4xf32>
    %4 = tpu.concatenate %1, %3 in 0 : vector<8x24x4xf32>, vector<2x24x4xf32> -> vector<10x24x4xf32>
    %c0_7 = arith.constant 0 : index
    %c0_8 = arith.constant 0 : index
    %c0_9 = arith.constant 0 : index
    %c0_10 = arith.constant 0 : index
    %5 = vector.load %arg5[%c0_7, %c0_8, %c0_9, %c0_10] : memref<3x3x4x4xf32, #tpu.memory_space<vmem>>, vector<3x3x4x4xf32>
    %6 = vector.extract_strided_slice %4 {offsets = [0, 0, 0], sizes = [10, 16, 4], strides = [1, 1, 1]} : vector<10x24x4xf32> to vector<10x16x4xf32>
    %7 = vector.extract_strided_slice %6 {offsets = [0, 0, 0], sizes = [8, 16, 4], strides = [1, 1, 1]} : vector<10x16x4xf32> to vector<8x16x4xf32>
    %8 = vector.shape_cast %7 : vector<8x16x4xf32> to vector<128x4xf32>
    %9 = vector.extract_strided_slice %5 {offsets = [0, 0, 0, 0], sizes = [1, 1, 4, 4], strides = [1, 1, 1, 1]} : vector<3x3x4x4xf32> to vector<1x1x4x4xf32>
    %10 = vector.shape_cast %9 : vector<1x1x4x4xf32> to vector<4x4xf32>
    %cst = arith.constant dense<0.000000e+00> : vector<128x4xf32>
    %11 = tpu.matmul %8, %10, %cst {dimension_numbers = #tpu.dot_dimension_numbers<[1], [0], [0], [1], [0, 0, 1, 1], [], []>} : vector<128x4xf32>, vector<4x4xf32>, vector<128x4xf32> -> vector<128x4xf32>
    %12 = vector.extract_strided_slice %6 {offsets = [1, 0, 0], sizes = [8, 16, 4], strides = [1, 1, 1]} : vector<10x16x4xf32> to vector<8x16x4xf32>
    %13 = vector.shape_cast %12 : vector<8x16x4xf32> to vector<128x4xf32>
    %14 = vector.extract_strided_slice %5 {offsets = [1, 0, 0, 0], sizes = [1, 1, 4, 4], strides = [1, 1, 1, 1]} : vector<3x3x4x4xf32> to vector<1x1x4x4xf32>
    %15 = vector.shape_cast %14 : vector<1x1x4x4xf32> to vector<4x4xf32>
    %cst_11 = arith.constant dense<0.000000e+00> : vector<128x4xf32>
    %16 = tpu.matmul %13, %15, %cst_11 {dimension_numbers = #tpu.dot_dimension_numbers<[1], [0], [0], [1], [0, 0, 1, 1], [], []>} : vector<128x4xf32>, vector<4x4xf32>, vector<128x4xf32> -> vector<128x4xf32>
    %17 = arith.addf %11, %16 : vector<128x4xf32>
    %18 = vector.extract_strided_slice %6 {offsets = [2, 0, 0], sizes = [8, 16, 4], strides = [1, 1, 1]} : vector<10x16x4xf32> to vector<8x16x4xf32>
    %19 = vector.shape_cast %18 : vector<8x16x4xf32> to vector<128x4xf32>
    %20 = vector.extract_strided_slice %5 {offsets = [2, 0, 0, 0], sizes = [1, 1, 4, 4], strides = [1, 1, 1, 1]} : vector<3x3x4x4xf32> to vector<1x1x4x4xf32>
    %21 = vector.shape_cast %20 : vector<1x1x4x4xf32> to vector<4x4xf32>
    %cst_12 = arith.constant dense<0.000000e+00> : vector<128x4xf32>
    %22 = tpu.matmul %19, %21, %cst_12 {dimension_numbers = #tpu.dot_dimension_numbers<[1], [0], [0], [1], [0, 0, 1, 1], [], []>} : vector<128x4xf32>, vector<4x4xf32>, vector<128x4xf32> -> vector<128x4xf32>
    %23 = arith.addf %17, %22 : vector<128x4xf32>
    %24 = vector.extract_strided_slice %4 {offsets = [0, 1, 0], sizes = [10, 16, 4], strides = [1, 1, 1]} : vector<10x24x4xf32> to vector<10x16x4xf32>
    %25 = vector.extract_strided_slice %24 {offsets = [0, 0, 0], sizes = [8, 16, 4], strides = [1, 1, 1]} : vector<10x16x4xf32> to vector<8x16x4xf32>
    %26 = vector.shape_cast %25 : vector<8x16x4xf32> to vector<128x4xf32>
    %27 = vector.extract_strided_slice %5 {offsets = [0, 1, 0, 0], sizes = [1, 1, 4, 4], strides = [1, 1, 1, 1]} : vector<3x3x4x4xf32> to vector<1x1x4x4xf32>
    %28 = vector.shape_cast %27 : vector<1x1x4x4xf32> to vector<4x4xf32>
    %cst_13 = arith.constant dense<0.000000e+00> : vector<128x4xf32>
    %29 = tpu.matmul %26, %28, %cst_13 {dimension_numbers = #tpu.dot_dimension_numbers<[1], [0], [0], [1], [0, 0, 1, 1], [], []>} : vector<128x4xf32>, vector<4x4xf32>, vector<128x4xf32> -> vector<128x4xf32>
    %30 = arith.addf %23, %29 : vector<128x4xf32>
    %31 = vector.extract_strided_slice %24 {offsets = [1, 0, 0], sizes = [8, 16, 4], strides = [1, 1, 1]} : vector<10x16x4xf32> to vector<8x16x4xf32>
    %32 = vector.shape_cast %31 : vector<8x16x4xf32> to vector<128x4xf32>
    %33 = vector.extract_strided_slice %5 {offsets = [1, 1, 0, 0], sizes = [1, 1, 4, 4], strides = [1, 1, 1, 1]} : vector<3x3x4x4xf32> to vector<1x1x4x4xf32>
    %34 = vector.shape_cast %33 : vector<1x1x4x4xf32> to vector<4x4xf32>
    %cst_14 = arith.constant dense<0.000000e+00> : vector<128x4xf32>
    %35 = tpu.matmul %32, %34, %cst_14 {dimension_numbers = #tpu.dot_dimension_numbers<[1], [0], [0], [1], [0, 0, 1, 1], [], []>} : vector<128x4xf32>, vector<4x4xf32>, vector<128x4xf32> -> vector<128x4xf32>
    %36 = arith.addf %30, %35 : vector<128x4xf32>
    %37 = vector.extract_strided_slice %24 {offsets = [2, 0, 0], sizes = [8, 16, 4], strides = [1, 1, 1]} : vector<10x16x4xf32> to vector<8x16x4xf32>
    %38 = vector.shape_cast %37 : vector<8x16x4xf32> to vector<128x4xf32>
    %39 = vector.extract_strided_slice %5 {offsets = [2, 1, 0, 0], sizes = [1, 1, 4, 4], strides = [1, 1, 1, 1]} : vector<3x3x4x4xf32> to vector<1x1x4x4xf32>
    %40 = vector.shape_cast %39 : vector<1x1x4x4xf32> to vector<4x4xf32>
    %cst_15 = arith.constant dense<0.000000e+00> : vector<128x4xf32>
    %41 = tpu.matmul %38, %40, %cst_15 {dimension_numbers = #tpu.dot_dimension_numbers<[1], [0], [0], [1], [0, 0, 1, 1], [], []>} : vector<128x4xf32>, vector<4x4xf32>, vector<128x4xf32> -> vector<128x4xf32>
    %42 = arith.addf %36, %41 : vector<128x4xf32>
    %43 = vector.extract_strided_slice %4 {offsets = [0, 2, 0], sizes = [10, 16, 4], strides = [1, 1, 1]} : vector<10x24x4xf32> to vector<10x16x4xf32>
    %44 = vector.extract_strided_slice %43 {offsets = [0, 0, 0], sizes = [8, 16, 4], strides = [1, 1, 1]} : vector<10x16x4xf32> to vector<8x16x4xf32>
    %45 = vector.shape_cast %44 : vector<8x16x4xf32> to vector<128x4xf32>
    %46 = vector.extract_strided_slice %5 {offsets = [0, 2, 0, 0], sizes = [1, 1, 4, 4], strides = [1, 1, 1, 1]} : vector<3x3x4x4xf32> to vector<1x1x4x4xf32>
    %47 = vector.shape_cast %46 : vector<1x1x4x4xf32> to vector<4x4xf32>
    %cst_16 = arith.constant dense<0.000000e+00> : vector<128x4xf32>
    %48 = tpu.matmul %45, %47, %cst_16 {dimension_numbers = #tpu.dot_dimension_numbers<[1], [0], [0], [1], [0, 0, 1, 1], [], []>} : vector<128x4xf32>, vector<4x4xf32>, vector<128x4xf32> -> vector<128x4xf32>
    %49 = arith.addf %42, %48 : vector<128x4xf32>
    %50 = vector.extract_strided_slice %43 {offsets = [1, 0, 0], sizes = [8, 16, 4], strides = [1, 1, 1]} : vector<10x16x4xf32> to vector<8x16x4xf32>
    %51 = vector.shape_cast %50 : vector<8x16x4xf32> to vector<128x4xf32>
    %52 = vector.extract_strided_slice %5 {offsets = [1, 2, 0, 0], sizes = [1, 1, 4, 4], strides = [1, 1, 1, 1]} : vector<3x3x4x4xf32> to vector<1x1x4x4xf32>
    %53 = vector.shape_cast %52 : vector<1x1x4x4xf32> to vector<4x4xf32>
    %cst_17 = arith.constant dense<0.000000e+00> : vector<128x4xf32>
    %54 = tpu.matmul %51, %53, %cst_17 {dimension_numbers = #tpu.dot_dimension_numbers<[1], [0], [0], [1], [0, 0, 1, 1], [], []>} : vector<128x4xf32>, vector<4x4xf32>, vector<128x4xf32> -> vector<128x4xf32>
    %55 = arith.addf %49, %54 : vector<128x4xf32>
    %56 = vector.extract_strided_slice %43 {offsets = [2, 0, 0], sizes = [8, 16, 4], strides = [1, 1, 1]} : vector<10x16x4xf32> to vector<8x16x4xf32>
    %57 = vector.shape_cast %56 : vector<8x16x4xf32> to vector<128x4xf32>
    %58 = vector.extract_strided_slice %5 {offsets = [2, 2, 0, 0], sizes = [1, 1, 4, 4], strides = [1, 1, 1, 1]} : vector<3x3x4x4xf32> to vector<1x1x4x4xf32>
    %59 = vector.shape_cast %58 : vector<1x1x4x4xf32> to vector<4x4xf32>
    %cst_18 = arith.constant dense<0.000000e+00> : vector<128x4xf32>
    %60 = tpu.matmul %57, %59, %cst_18 {dimension_numbers = #tpu.dot_dimension_numbers<[1], [0], [0], [1], [0, 0, 1, 1], [], []>} : vector<128x4xf32>, vector<4x4xf32>, vector<128x4xf32> -> vector<128x4xf32>
    %61 = arith.addf %55, %60 : vector<128x4xf32>
    %62 = vector.shape_cast %61 : vector<128x4xf32> to vector<8x16x4xf32>
    %c0_19 = arith.constant 0 : index
    %c0_20 = arith.constant 0 : index
    %63 = vector.load %arg6[%c0_19, %c0_20] : memref<1x4xf32, #tpu.memory_space<vmem>>, vector<1x4xf32>
    %64 = vector.shape_cast %63 : vector<1x4xf32> to vector<1x1x4xf32>
    %65 = vector.broadcast %64 : vector<1x1x4xf32> to vector<8x16x4xf32>
    %66 = arith.addf %62, %65 : vector<8x16x4xf32>
    %cst_21 = arith.constant 0.000000e+00 : f32
    %67 = vector.broadcast %cst_21 : f32 to vector<8x16x4xf32>
    %68 = arith.maximumf %66, %67 : vector<8x16x4xf32>
    %c0_22 = arith.constant 0 : index
    %c0_23 = arith.constant 0 : index
    %c0_24 = arith.constant 0 : index
    %c0_25 = arith.constant 0 : index
    %69 = vector.load %arg7[%c0_22, %c0_23, %c0_24, %c0_25] : memref<1x8x16x4xf32, #tpu.memory_space<vmem>>, vector<1x8x16x4xf32>
    %70 = vector.shape_cast %69 : vector<1x8x16x4xf32> to vector<8x16x4xf32>
    %71 = vector.shape_cast %68 : vector<8x16x4xf32> to vector<1x8x16x4xf32>
    tpu.vector_store %arg7[%c0_22, %c0_23, %c0_24, %c0_25], %71 {strides = array<i32>} : memref<1x8x16x4xf32, #tpu.memory_space<vmem>>, vector<1x8x16x4xf32>,
    return
  }
  func.func @transform_0(%arg0: i32, %arg1: i32, %arg2: i32) -> (i32, i32, i32, i32) {
    %c0_i32 = arith.constant 0 : i32
    %c0_i32_0 = arith.constant 0 : i32
    %c0_i32_1 = arith.constant 0 : i32
    return %arg0, %arg1, %c0_i32, %c0_i32_0 : i32, i32, i32, i32
  }
  func.func @transform_1(%arg0: i32, %arg1: i32, %arg2: i32) -> (i32, i32, i32, i32) {
    %c1_i32 = arith.constant 1 : i32
    %0 = arith.addi %arg1, %c1_i32 : i32
    %c1_i32_0 = arith.constant 1 : i32
    %1 = arith.muli %0, %c1_i32_0 : i32
    %c0_i32 = arith.constant 0 : i32
    %c0_i32_1 = arith.constant 0 : i32
    %c0_i32_2 = arith.constant 0 : i32
    return %arg0, %1, %c0_i32, %c0_i32_1 : i32, i32, i32, i32
  }
  func.func @transform_2(%arg0: i32, %arg1: i32, %arg2: i32) -> (i32, i32, i32, i32) {
    %c0_i32 = arith.constant 0 : i32
    %c0_i32_0 = arith.constant 0 : i32
    %c0_i32_1 = arith.constant 0 : i32
    %c0_i32_2 = arith.constant 0 : i32
    return %c0_i32, %c0_i32_0, %c0_i32_1, %arg2 : i32, i32, i32, i32
  }
  func.func @transform_3(%arg0: i32, %arg1: i32, %arg2: i32) -> (i32, i32) {
    %c0_i32 = arith.constant 0 : i32
    %c0_i32_0 = arith.constant 0 : i32
    return %c0_i32, %arg2 : i32, i32
  }
  func.func @transform_4(%arg0: i32, %arg1: i32, %arg2: i32) -> (i32, i32, i32, i32) {
    %c0_i32 = arith.constant 0 : i32
    %c0_i32_0 = arith.constant 0 : i32
    return %arg0, %arg1, %c0_i32, %arg2 : i32, i32, i32, i32
  }
}

</mosaic_0001>

<bundles_post_ra>
// kernel: tpu_custom_call.1
= control target key start
LH: loop header
LB: loop body
LE: loop exit
PB: predicated region body
PF: predicated region fallthrough
CT: control target
= control target key end

     0   :  { %s3084_s15 = smov 0   ;;  %s3086_s16 = smov 0   ;;  %s3820_s0 = inlined_call_operand.vmem [shape: f32[2,24,24,4], index: 0, kind: input, shape index: {}]   ;;  %s3821_s1 = inlined_call_operand.vmem [shape: f32[2,24,24,4], index: 1, kind: input, shape index: {}]   ;;  %s3822_s2 = inlined_call_operand.vmem [shape: f32[3,3,4,4], index: 2, kind: input, shape index: {}]   ;;  %s3823_s3 = inlined_call_operand.vmem [shape: f32[1,4], index: 3, kind: input, shape index: {}]   ;;  %s3824_s4 = inlined_call_operand.vmem [shape: f32[2,16,16,4], index: 4, kind: output, shape index: {}]  }
   0x1   :  { %s3088_s17 = smov 0   ;;  %s3090_s18 = smov 0  }
   0x2   :  { %s3092_s19 = smov 0  }
   0x3 LB: > { %s29_s20 = sadd.s32 1, %s3049_s17  ;;  %s33_s21 = sadd.s32 1, %s3053_s18  ;;  %s3057_s19 = sphi %s3092_s19, %s14_s19   ;;  %s3053_s18 = sphi %s3090_s18, %s3829_s18   ;;  %s3049_s17 = sphi %s3088_s17, %s3828_s17   ;;  %s3045_s16 = sphi %s3086_s16, %s3827_s16   ;;  %s3041_s15 = sphi %s3084_s15, %s3826_s15  }
   0x4   : > { %p31_p0 = scmp.ge.s32.totalorder %s29_s20, 2  ;;  %p2292_p1 = scmp.ge.s32.totalorder %s3057_s19, 1 }
   0x5   : > { %p232_p2 = scmp.lt.s32.totalorder %s3057_s19, 5 }
   0x6   : > { %s3831_s20 = smov (%p31_p0, %s29_s20), 0  ;;  %s3833_s21 = smov (!%p31_p0, %s33_s21), %s3053_s18 }
   0x7   : > { %p233_p3 = pnand %p2292_p1, %p232_p2  ;;  %p35_p4 = scmp.ge.s32.totalorder %s3833_s21, 2 }
   0x8   : > { %v367_v0 = vld [vmem:[%s3822_s2 + $0xc] sm:$0xf] (!%p233_p3)  ;;  %vm422_vm0 = vcmask (!%p233_p3), 1043456   ;;  %s3117_s24 = sshll.u32 (!%p233_p3), %s3041_s15, 3  ;;  %p290_p5 = scmp.lt.s32.totalorder (!%p233_p3), %s3045_s16, 1  ;;  %vm373_vm1 = vcmask (!%p233_p3), 31744  }
   0x9   : > { %s3835_s21 = smov (%p35_p4, %s3833_s21), 0  ;;  %236 = sbr.rel (%p233_p3) target bundleno = 389 (0x185), region = 36 }
   0xa   : > { %2612 = vmatprep.subr.msk.mxu1 (!%p233_p3), %vm422_vm0, %v367_v0  ;;  %p292_p6 = scmp.lt.s32.totalorder (!%p233_p3), %s3117_s24, 23  ;;  %v3124_v1 = vld [vmem:[%s3822_s2 + $0x10] sm:$0xf] (!%p233_p3)  ;;  %v364_v2 = vld [vmem:[%s3822_s2] sm:$0xf] (!%p233_p3)  ;;  %vm903_vm2 = vcmask (!%p233_p3), 1046528  }
   0xb   : > { %2613 = vmatpush3.msk.msra.mxu1 (!%p233_p3), %vm422_vm0, %v367_v0  ;;  %2716 = vmatprep.subr.msk.mxu0 (!%p233_p3), %vm422_vm0, %v3124_v1  ;;  %v371_v3 = vld [vmem:[%s3822_s2 + $0x1c] sm:$0xf] (!%p233_p3)  ;;  %s2458_s13 = sadd.s32 (!%p233_p3), 8, %s3117_s24  ;;  %v3173_v11 = vld [vmem:[%s3822_s2 + $0x18] sm:$0xf] (!%p233_p3)  ;;  %vm1488_vm3 = vcmask (!%p233_p3), 1045504  }
   0xc   : > { %2717 = vmatpush3.msk.msra.mxu0 (!%p233_p3), %vm422_vm0, %v3124_v1  ;;  %2638 = vmatprep.subr.msk.mxu1 (!%p233_p3), %vm422_vm0, %v364_v2  ;;  %p3203_p7 = scmp.lt.s32.totalorder (!%p233_p3), %s2458_s13, 23  ;;  %v366_v27 = vld [vmem:[%s3822_s2 + $0x8] sm:$0xf] (!%p233_p3)  ;;  %v3313_v43 = vld [vmem:[%s3822_s2 + $0x14] sm:$0xf] (!%p233_p3)  ;;  %p323_p8 = scmp.lt.s32.totalorder (!%p233_p3), %s3117_s24, 15 }
   0xd   : > { %2742 = vmatprep.subr.msk.mxu0 (!%p233_p3), %vm422_vm0, %v371_v3 }
  0x10   : > { %s3837_s16 = smov (!%p290_p5, %s3045_s16), 1  ;;  %s3839_s13 = smov (!%p3203_p7, %s2458_s13), 23 }
  0x11   : > { %s293_s5 = scalar_select %p292_p6, %s3117_s24, 23 }
  0x12   : > { %s2977_s6 = smul.u32 72, %s3837_s16  ;;  %s3841_s24 = smov (!%p323_p8, %s3117_s24), 15 }
  0x13   : > { %s2976_s7 = smul.u32 3, %s293_s5 }
  0x14   : > { %s2978_s26 = smul.u32 3, %s3839_s13  ;;  %s2299_s13 = sshll.u32 %s3837_s16, 5 }
  0x15   : > { %s296_s8 = sadd.s32 %s2977_s6, %s2976_s7 }
  0x16   : > { %s2294_s9 = sshll.u32 %s296_s8, 3  ;;  %s308_s27 = sadd.s32 %s2978_s26, %s2977_s6 }
  0x17   : > { %s3148_s12 = scalar_lea.vmem %s3820_s0, %s2294_s9  ;;  %s2296_s28 = sshll.u32 %s308_s27, 3 }
  0x18   : > { %v3151_v4 = vld [vmem:[%s3148_s12 + $0x18] sm:$0xff]  ;;  %v3154_v5 = vld [vmem:[%s3148_s12 + $0x20] sm:$0xff]  ;;  %v3157_v6 = vld [vmem:[%s3148_s12 + $0x30] sm:$0xff]  ;;  %s3308_s5 = scalar_lea.vmem %s3821_s1, %s2296_s28 }
  0x19   : > { %2614 = vmatprep.mubr.msk.f32.mxu1 %vm373_vm1, %v3151_v4  ;;  %v909_v7 = vrot.slane %v3151_v4, 1  ;;  %v910_v8 = vrot.slane %v3154_v5, 1  ;;  %v3165_v9 = vld [vmem:[%s3148_s12 + $0x28] sm:$0xff]  ;;  %v3168_v10 = vld [vmem:[%s3148_s12 + $0x38] sm:$0xff]  ;;  %v914_v13 = vrot.slane %v3157_v6, 1  ;;  %v3184_v16 = vld [vmem:[%s3148_s12 + $0x40] sm:$0xff] }
  0x1a   : > { %2615 = vmatmul.mubr.msk.f32.vlgmr.msra.gmra.mrb[0].mxu1 %vm373_vm1, %v3154_v5  ;;  %v912_v12 = vrot.slane %v3165_v9, 1  ;;  %v915_v14 = vrot.slane %v3168_v10, 1  ;;  %v3181_v15 = vld [vmem:[%s3148_s12 + $0x48] sm:$0xff]  ;;  %v3187_v17 = vld [vmem:[%s3148_s12 + $0x50] sm:$0xff]  ;;  %v917_v19 = vrot.slane %v3184_v16, 1  ;;  %v3199_v22 = vld [vmem:[%s3148_s12 + $0x58] sm:$0xff] }
  0x1b   : > { %v3190_v18 = vsel %vm903_vm2, %v909_v7, %v910_v8  ;;  %2617 = vmatprep.mubr.msk.f32.mxu1 %vm373_vm1, %v3157_v6  ;;  %2639 = vmatpush3.msk.msra.mxu1 %vm422_vm0, %v364_v2  ;;  %v919_v20 = vrot.slane %v3181_v15, 1  ;;  %v920_v21 = vrot.slane %v3187_v17, 1  ;;  %v3216_v25 = vld [vmem:[%s3148_s12 + $0x60] sm:$0xff]  ;;  %v3219_v26 = vld [vmem:[%s3148_s12 + $0x68] sm:$0xff]  ;;  %v922_v29 = vrot.slane %v3199_v22, 1  ;;  %v3245_v33 = vld [vmem:[%s3148_s12 + $0x70] sm:$0xff] }
  0x1c   : > { %2718 = vmatprep.mubr.msk.f32.mxu0 %vm373_vm1, %v3190_v18  ;;  %v3210_v23 = vsel %vm903_vm2, %v910_v8, %v912_v12  ;;  %v3213_v24 = vsel %vm903_vm2, %v914_v13, %v915_v14  ;;  %2664 = vmatprep.subr.msk.mxu1 %vm422_vm0, %v3173_v11  ;;  %v3232_v28 = vsel %vm903_vm2, %v915_v14, %v917_v19  ;;  %v924_v31 = vrot.slane %v3216_v25, 1  ;;  %v3268_v37 = vld [vmem:[%s3148_s12 + $0x78] sm:$0xff]  ;;  %v3282_v39 = vld [vmem:[%s3148_s12 + $0x80] sm:$0xff]  ;;  %v3287_v40 = vld [vmem:[%s3148_s12 + $0x90] sm:$0xff] }
  0x1d   : > { %2719 = vmatmul.mubr.msk.f32.vlgmr.msra.gmra.mrb[0].mxu0 %vm373_vm1, %v3210_v23  ;;  %v3240_v30 = vsel %vm903_vm2, %v919_v20, %v920_v21  ;;  %v925_v32 = vrot.slane %v3219_v26, 1  ;;  %v3259_v34 = vsel %vm903_vm2, %v920_v21, %v922_v29  ;;  %v927_v35 = vrot.slane %v3245_v33, 1  ;;  %v3298_v41 = vld [vmem:[%s3148_s12 + $0x98] sm:$0xff]  ;;  %v3301_v42 = vld [vmem:[%s3148_s12 + $0xa8] sm:$0xff]  ;;  %v3323_v44 = vld [vmem:[%s3148_s12 + $0xb0] sm:$0xff] }
  0x1e   : > { %2743 = vmatpush3.msk.msra.mxu0 %vm422_vm0, %v371_v3  ;;  %2618 = vmatmul.mubr.msk.f32.gmra.mrb[2].mxu1 %vm373_vm1, %v3168_v10  ;;  %v929_v45 = vrot.slane %v3268_v37, 1  ;;  %v930_v46 = vrot.slane %v3282_v39, 1  ;;  %v3328_v47 = vld [vmem:[%s3148_s12 + $0x88] sm:$0xff]  ;;  %v3331_v48 = vld [vmem:[%s3308_s5] sm:$0xff]  ;;  %v934_v56 = vrot.slane %v3287_v40, 1  ;;  %v935_v57 = vrot.slane %v3298_v41, 1 }
  0x1f   : > { %2721 = vmatprep.mubr.msk.f32.mxu0 %vm373_vm1, %v3213_v24  ;;  %2620 = vmatprep.mubr.msk.f32.mxu1 %vm373_vm1, %v3181_v15  ;;  %v3265_v36 = vsel %vm903_vm2, %v924_v31, %v925_v32  ;;  %v3277_v38 = vsel %vm903_vm2, %v925_v32, %v927_v35  ;;  %v3334_v49 = vld [vmem:[%s3308_s5 + $0x20] sm:$0xff]  ;;  %v3337_v50 = vld [vmem:[%s3308_s5 + $0x28] sm:$0xff]  ;;  %v932_v53 = vrot.slane %v3328_v47, 1  ;;  %v939_v2 = vrot.slane %v3301_v42, 1  ;;  %v3392_v7 = vld [vmem:[%s3148_s12 + $0xb8] sm:$0xff] }
  0x20   : > { %2768 = vmatprep.subr.msk.mxu0 %vm422_vm0, %v366_v27  ;;  %v1899_v51 = vrot.slane %v3334_v49, 2  ;;  %v1901_v52 = vrot.slane %v3337_v50, 2  ;;  %v3353_v54 = vld [vmem:[%s3308_s5 + $0x8] sm:$0xff]  ;;  %v3356_v55 = vsel %vm903_vm2, %v929_v45, %v930_v46  ;;  %v3361_v58 = vld [vmem:[%s3148_s12 + $0xa0] sm:$0xff]  ;;  %v3387_v0 = vsel %vm903_vm2, %v934_v56, %v935_v57  ;;  %v3419_v21 = vld [vmem:[%s3308_s5 + $0x10] sm:$0xff] }
  0x21   : > { %2722 = vmatmul.mubr.msk.f32.gmra.mrb[2].mxu0 %vm373_vm1, %v3232_v28  ;;  %v3369_v60 = vld [vmem:[%s3148_s12] sm:$0xff]  ;;  %v3378_v61 = vsel %vm903_vm2, %v930_v46, %v932_v53  ;;  %v937_v62 = vrot.slane %v3361_v58, 1  ;;  %v3384_v63 = vld [vmem:[%s3148_s12 + $0x8] sm:$0xff]  ;;  %v940_v3 = vrot.slane %v3323_v44, 1  ;;  %v942_v13 = vrot.slane %v3392_v7, 1 }
  0x22   : > { %2621 = vmatmul.mubr.msk.f32.gmra.mrb[4].mxu1 %vm373_vm1, %v3187_v17  ;;  %2724 = vmatprep.mubr.msk.f32.mxu0 %vm373_vm1, %v3240_v30  ;;  %v3366_v59 = vsel %vm1488_vm3, %v1899_v51, %v1901_v52  ;;  %v3399_v8 = vld [vmem:[%s3822_s2 + $0x4] sm:$0xf]  ;;  %v1141_v14 = vrot.slane %v3331_v48, 1  ;;  %v1142_v19 = vrot.slane %v3353_v54, 1  ;;  %v1144_v29 = vrot.slane %v3419_v21, 1 }
  0x23   : > { %2623 = vmatprep.mubr.msk.f32.mxu1 %vm373_vm1, %v3216_v25  ;;  %v3406_v12 = vsel %vm903_vm2, %v935_v57, %v937_v62  ;;  %v3416_v20 = vsel %vm903_vm2, %v939_v2, %v940_v3  ;;  %v1316_v35 = vrot.slane %v3334_v49, 1  ;;  %v1318_v46 = vrot.slane %v3337_v50, 1  ;;  %v3459_v57 = vld [vmem:[%s3148_s12 + $0x10] sm:$0xff]  ;;  %s2298_s12 = sshll.u32 %s3841_s24, 1 }
  0x24   : > { %v3439_v31 = vsel %vm903_vm2, %v1141_v14, %v1142_v19  ;;  %v3450_v45 = vsel %vm903_vm2, %v1142_v19, %v1144_v29  ;;  %v1489_v52 = vrot.slane %v3369_v60, 2  ;;  %v1490_v56 = vrot.slane %v3384_v63, 2  ;;  %s330_s14 = sadd.s32 %s2299_s13, %s2298_s12 }
  0x25   : > { %2725 = vmatmul.mubr.msk.f32.gmra.mrb[4].mxu0 %vm373_vm1, %v3259_v34  ;;  %v1319_v50 = vsel %vm903_vm2, %v1316_v35, %v1318_v46  ;;  %v1492_v62 = vrot.slane %v3459_v57, 2  ;;  %v1497_v19 = vrot.slane %v3165_v9, 2  ;;  %v1499_v29 = vrot.slane %v3157_v6, 2  ;;  %s2300_s23 = sshll.u32 %s330_s14, 3 }
  0x26   : > { %2624 = vmatmul.mubr.msk.f32.gmra.mrb[6].mxu1 %vm373_vm1, %v3219_v26  ;;  %2727 = vmatprep.mubr.msk.f32.mxu0 %vm373_vm1, %v3265_v36  ;;  %v1491_v2 = vsel %vm1488_vm3, %v1489_v52, %v1490_v56  ;;  %v1504_v52 = vrot.slane %v3181_v15, 2  ;;  %s3756_s27 = scalar_lea.vmem %s3824_s4, %s2300_s23 }
  0x27   : > { %2626 = vmatprep.mubr.msk.f32.mxu1 %vm373_vm1, %v3268_v37  ;;  %v1493_v14 = vsel %vm1488_vm3, %v1490_v56, %v1492_v62  ;;  %v1510_v62 = vrot.slane %v3219_v26, 2 }
  0x29   : > { %2728 = vmatmul.mubr.msk.f32.gmra.mrb[6].mxu0 %vm373_vm1, %v3277_v38 }
  0x2a   : > { %2627 = vmatmul.mubr.msk.f32.gmra.mrb[8].mxu1 %vm373_vm1, %v3282_v39  ;;  %2744 = vmatprep.mubr.msk.f32.mxu0 %vm373_vm1, %v3213_v24 }
  0x2b   : > { %2629 = vmatprep.mubr.msk.f32.mxu1 %vm373_vm1, %v3287_v40 }
  0x2d   : > { %2745 = vmatmul.mubr.msk.f32.vlgmr.msra.gmra.mrb[0].mxu0 %vm373_vm1, %v3232_v28 }
  0x2e   : > { %2769 = vmatpush3.msk.msra.mxu0 %vm422_vm0, %v366_v27  ;;  %2630 = vmatmul.mubr.msk.f32.gmra.mrb[10].mxu1 %vm373_vm1, %v3298_v41  ;;  %v3422_v27 = vld [vmem:[%s3308_s5 + $0x18] sm:$0xff] }
  0x2f   : > { %2747 = vmatprep.mubr.msk.f32.mxu0 %vm373_vm1, %v3240_v30  ;;  %2632 = vmatprep.mubr.msk.f32.mxu1 %vm373_vm1, %v3301_v42  ;;  %v1315_v32 = vrot.slane %v3422_v27, 1 }
  0x30   : > { %2794 = vmatprep.subr.msk.mxu0 %vm422_vm0, %v3313_v43 }
  0x31   : > { %2748 = vmatmul.mubr.msk.f32.gmra.mrb[2].mxu0 %vm373_vm1, %v3259_v34  ;;  %v1317_v53 = vsel %vm903_vm2, %v1315_v32, %v1316_v35  ;;  %v3490_v32 = vld [vmem:[%s3822_s2 + $0x20] sm:$0xf]  ;;  %v1502_v35 = vrot.slane %v3184_v16, 2 }
  0x32   : > { %2633 = vmatmul.mubr.msk.f32.gmra.mrb[12].mxu1 %vm373_vm1, %v3323_v44  ;;  %2750 = vmatprep.mubr.msk.f32.mxu0 %vm373_vm1, %v3265_v36 }
  0x33   : > { %2635 = vmatprep.mubr.msk.f32.mxu1 %vm373_vm1, %v3331_v48 }
  0x35   : > { %2751 = vmatmul.mubr.msk.f32.gmra.mrb[4].mxu0 %vm373_vm1, %v3277_v38 }
  0x36   : > { %2636 = vmatmul.mubr.msk.f32.gmra.mrb[14].mxu1 %vm373_vm1, %v3353_v54  ;;  %2753 = vmatprep.mubr.msk.f32.mxu0 %vm373_vm1, %v3356_v55 }
  0x37   : > { %2640 = vmatprep.mubr.msk.f32.mxu1 %vm373_vm1, %v3369_v60 }
  0x39   : > { %2754 = vmatmul.mubr.msk.f32.gmra.mrb[6].mxu0 %vm373_vm1, %v3378_v61 }
  0x3a   : > { %2641 = vmatmul.mubr.msk.f32.vlgmr.msra.gmra.mrb[0].mxu1 %vm373_vm1, %v3384_v63  ;;  %2756 = vmatprep.mubr.msk.f32.mxu0 %vm373_vm1, %v3387_v0 }
  0x3b   : > { %2643 = vmatprep.mubr.msk.f32.mxu1 %vm373_vm1, %v3151_v4  ;;  %2665 = vmatpush3.msk.msra.mxu1 %vm422_vm0, %v3173_v11  ;;  %v3433_v11 = vsel %vm903_vm2, %v940_v3, %v942_v13  ;;  %v1494_v3 = vrot.slane %v3151_v4, 2  ;;  %v1495_v13 = vrot.slane %v3154_v5, 2  ;;  %v1500_v4 = vrot.slane %v3168_v10, 2 }
  0x3c   : > { %2690 = vmatprep.subr.msk.mxu1 %vm422_vm0, %v3399_v8 }
  0x3d   : > { %2757 = vmatmul.mubr.msk.f32.gmra.mrb[8].mxu0 %vm373_vm1, %v3406_v12  ;;  %v1498_v9 = vsel %vm1488_vm3, %v1495_v13, %v1497_v19  ;;  %v3503_v46 = vsel %vm1488_vm3, %v1499_v29, %v1500_v4  ;;  %v3515_v16 = vsel %vm1488_vm3, %v1500_v4, %v1502_v35  ;;  %v1519_v29 = vrot.slane %v3287_v40, 2 }
  0x3e   : > { %2644 = vmatmul.mubr.msk.f32.gmra.mrb[2].mxu1 %vm373_vm1, %v3154_v5  ;;  %2759 = vmatprep.mubr.msk.f32.mxu0 %vm373_vm1, %v3416_v20  ;;  %v3484_v5 = vsel %vm1488_vm3, %v1494_v3, %v1495_v13  ;;  %v1514_v13 = vrot.slane %v3268_v37, 2  ;;  %v1524_v4 = vrot.slane %v3301_v42, 2  ;;  %v1525_v35 = vrot.slane %v3323_v44, 2 }
  0x3f   : > { %2646 = vmatprep.mubr.msk.f32.mxu1 %vm373_vm1, %v3157_v6 }
  0x41   : > { %2760 = vmatmul.mubr.msk.f32.gmra.mrb[10].mxu0 %vm373_vm1, %v3433_v11 }
  0x42   : > { %2647 = vmatmul.mubr.msk.f32.gmra.mrb[4].mxu1 %vm373_vm1, %v3168_v10  ;;  %2762 = vmatprep.mubr.msk.f32.mxu0 %vm373_vm1, %v3439_v31 }
  0x43   : > { %2649 = vmatprep.mubr.msk.f32.mxu1 %vm373_vm1, %v3181_v15 }
  0x45   : > { %2763 = vmatmul.mubr.msk.f32.gmra.mrb[12].mxu0 %vm373_vm1, %v3450_v45 }
  0x46   : > { %2650 = vmatmul.mubr.msk.f32.gmra.mrb[6].mxu1 %vm373_vm1, %v3187_v17  ;;  %2765 = vmatprep.mubr.msk.f32.mxu0 %vm373_vm1, %v1317_v53  ;;  %v1507_v53 = vrot.slane %v3199_v22, 2 }
  0x47   : > { %2652 = vmatprep.mubr.msk.f32.mxu1 %vm373_vm1, %v3216_v25 }
  0x49   : > { %2766 = vmatmul.mubr.msk.f32.gmra.mrb[14].mxu0 %vm373_vm1, %v1319_v50  ;;  %v1509_v50 = vrot.slane %v3216_v25, 2 }
  0x4a   : > { %2653 = vmatmul.mubr.msk.f32.gmra.mrb[8].mxu1 %vm373_vm1, %v3219_v26  ;;  %2770 = vmatprep.mubr.msk.f32.mxu0 %vm373_vm1, %v1491_v2  ;;  %v1512_v2 = vrot.slane %v3245_v33, 2 }
  0x4b   : > { %2655 = vmatprep.mubr.msk.f32.mxu1 %vm373_vm1, %v3268_v37  ;;  %v3538_v3 = vsel %vm1488_vm3, %v1509_v50, %v1510_v62 }
  0x4c   : > { %v3549_v33 = vsel %vm1488_vm3, %v1510_v62, %v1512_v2 }
  0x4d   : > { %2771 = vmatmul.mubr.msk.f32.vlgmr.msra.gmra.mrb[0].mxu0 %vm373_vm1, %v1493_v14  ;;  %v1515_v14 = vrot.slane %v3282_v39, 2 }
  0x4e   : > { %2795 = vmatpush3.msk.msra.mxu0 %vm422_vm0, %v3313_v43  ;;  %2656 = vmatmul.mubr.msk.f32.gmra.mrb[10].mxu1 %vm373_vm1, %v3282_v39  ;;  %v1505_v43 = vrot.slane %v3187_v17, 2 }
  0x4f   : > { %2773 = vmatprep.mubr.msk.f32.mxu0 %vm373_vm1, %v3484_v5  ;;  %2658 = vmatprep.mubr.msk.f32.mxu1 %vm373_vm1, %v3287_v40  ;;  %v3557_v19 = vsel %vm1488_vm3, %v1514_v13, %v1515_v14 }
  0x50   : > { %2820 = vmatprep.subr.msk.mxu0 %vm422_vm0, %v3490_v32  ;;  %v3521_v56 = vsel %vm1488_vm3, %v1504_v52, %v1505_v43  ;;  %v3532_v22 = vsel %vm1488_vm3, %v1505_v43, %v1507_v53 }
  0x51   : > { %2774 = vmatmul.mubr.msk.f32.gmra.mrb[2].mxu0 %vm373_vm1, %v1498_v9 }
  0x52   : > { %2659 = vmatmul.mubr.msk.f32.gmra.mrb[12].mxu1 %vm373_vm1, %v3298_v41  ;;  %2776 = vmatprep.mubr.msk.f32.mxu0 %vm373_vm1, %v3503_v46 }
  0x53   : > { %2661 = vmatprep.mubr.msk.f32.mxu1 %vm373_vm1, %v3301_v42 }
  0x55   : > { %2777 = vmatmul.mubr.msk.f32.gmra.mrb[4].mxu0 %vm373_vm1, %v3515_v16 }
  0x56   : > { %2662 = vmatmul.mubr.msk.f32.gmra.mrb[14].mxu1 %vm373_vm1, %v3323_v44  ;;  %2779 = vmatprep.mubr.msk.f32.mxu0 %vm373_vm1, %v3521_v56 }
  0x57   : > { %2666 = vmatprep.mubr.msk.f32.mxu1 %vm373_vm1, %v3157_v6  ;;  %v1517_v6 = vrot.slane %v3328_v47, 2  ;;  %v1522_v47 = vrot.slane %v3361_v58, 2  ;;  %v3593_v58 = vsel %vm1488_vm3, %v1524_v4, %v1525_v35 }
  0x59   : > { %2780 = vmatmul.mubr.msk.f32.gmra.mrb[6].mxu0 %vm373_vm1, %v3532_v22 }
  0x5a   : > { %2667 = vmatmul.mubr.msk.f32.vlgmr.msra.gmra.mrb[0].mxu1 %vm373_vm1, %v3168_v10  ;;  %2782 = vmatprep.mubr.msk.f32.mxu0 %vm373_vm1, %v3538_v3  ;;  %v1520_v10 = vrot.slane %v3298_v41, 2 }
  0x5b   : > { %2669 = vmatprep.mubr.msk.f32.mxu1 %vm373_vm1, %v3181_v15  ;;  %2691 = vmatpush3.msk.msra.mxu1 %vm422_vm0, %v3399_v8  ;;  %v3570_v15 = vsel %vm1488_vm3, %v1515_v14, %v1517_v6 }
  0x5c   : > { %2846 = vmatprep.subr.msk.mxu1 %vm422_vm0, %v3124_v1  ;;  %v3576_v8 = vsel %vm1488_vm3, %v1519_v29, %v1520_v10 }
  0x5d   : > { %2783 = vmatmul.mubr.msk.f32.gmra.mrb[8].mxu0 %vm373_vm1, %v3549_v33 }
  0x5e   : > { %2670 = vmatmul.mubr.msk.f32.gmra.mrb[2].mxu1 %vm373_vm1, %v3187_v17  ;;  %2785 = vmatprep.mubr.msk.f32.mxu0 %vm373_vm1, %v3557_v19  ;;  %v3587_v17 = vsel %vm1488_vm3, %v1520_v10, %v1522_v47 }
  0x5f   : > { %2672 = vmatprep.mubr.msk.f32.mxu1 %vm373_vm1, %v3216_v25  ;;  %v1527_v25 = vrot.slane %v3392_v7, 2 }
  0x61   : > { %2786 = vmatmul.mubr.msk.f32.gmra.mrb[10].mxu0 %vm373_vm1, %v3570_v15 }
  0x62   : > { %2673 = vmatmul.mubr.msk.f32.gmra.mrb[4].mxu1 %vm373_vm1, %v3219_v26  ;;  %2788 = vmatprep.mubr.msk.f32.mxu0 %vm373_vm1, %v3576_v8  ;;  %v3602_v26 = vsel %vm1488_vm3, %v1525_v35, %v1527_v25 }
  0x63   : > { %2675 = vmatprep.mubr.msk.f32.mxu1 %vm373_vm1, %v3268_v37  ;;  %v904_v37 = vrot.slane %v3369_v60, 1  ;;  %v1726_v60 = vrot.slane %v3353_v54, 2 }
  0x65   : > { %2789 = vmatmul.mubr.msk.f32.gmra.mrb[12].mxu0 %vm373_vm1, %v3587_v17 }
  0x66   : > { %2676 = vmatmul.mubr.msk.f32.gmra.mrb[6].mxu1 %vm373_vm1, %v3282_v39  ;;  %2791 = vmatprep.mubr.msk.f32.mxu0 %vm373_vm1, %v3593_v58  ;;  %v905_v39 = vrot.slane %v3384_v63, 1 }
  0x67   : > { %2678 = vmatprep.mubr.msk.f32.mxu1 %vm373_vm1, %v3287_v40  ;;  %v907_v40 = vrot.slane %v3459_v57, 1 }
  0x69   : > { %2792 = vmatmul.mubr.msk.f32.gmra.mrb[14].mxu0 %vm373_vm1, %v3602_v26 }
  0x6a   : > { %2679 = vmatmul.mubr.msk.f32.gmra.mrb[8].mxu1 %vm373_vm1, %v3298_v41  ;;  %2796 = vmatprep.mubr.msk.f32.mxu0 %vm373_vm1, %v3484_v5  ;;  %v906_v41 = vsel %vm903_vm2, %v904_v37, %v905_v39 }
  0x6b   : > { %2681 = vmatprep.mubr.msk.f32.mxu1 %vm373_vm1, %v3301_v42  ;;  %v908_v42 = vsel %vm903_vm2, %v905_v39, %v907_v40 }
  0x6d   : > { %2797 = vmatmul.mubr.msk.f32.vlgmr.msra.gmra.mrb[0].mxu0 %vm373_vm1, %v1498_v9 }
  0x6e   : > { %2821 = vmatpush3.msk.msra.mxu0 %vm422_vm0, %v3490_v32  ;;  %2682 = vmatmul.mubr.msk.f32.gmra.mrb[10].mxu1 %vm373_vm1, %v3323_v44  ;;  %v1725_v44 = vrot.slane %v3331_v48, 2 }
  0x6f   : > { %2799 = vmatprep.mubr.msk.f32.mxu0 %vm373_vm1, %v3503_v46  ;;  %2684 = vmatprep.mubr.msk.f32.mxu1 %vm373_vm1, %v3331_v48 }
  0x71   : > { %2800 = vmatmul.mubr.msk.f32.gmra.mrb[2].mxu0 %vm373_vm1, %v3515_v16 }
  0x72   : > { %2685 = vmatmul.mubr.msk.f32.gmra.mrb[12].mxu1 %vm373_vm1, %v3353_v54  ;;  %2802 = vmatprep.mubr.msk.f32.mxu0 %vm373_vm1, %v3521_v56 }
  0x73   : > { %2687 = vmatprep.mubr.msk.f32.mxu1 %vm373_vm1, %v3422_v27 }
  0x75   : > { %2803 = vmatmul.mubr.msk.f32.gmra.mrb[4].mxu0 %vm373_vm1, %v3532_v22 }
  0x76   : > { %2688 = vmatmul.mubr.msk.f32.gmra.mrb[14].mxu1 %vm373_vm1, %v3334_v49  ;;  %2805 = vmatprep.mubr.msk.f32.mxu0 %vm373_vm1, %v3538_v3 }
  0x77   : > { %2692 = vmatprep.mubr.msk.f32.mxu1 %vm373_vm1, %v906_v41 }
  0x79   : > { %2806 = vmatmul.mubr.msk.f32.gmra.mrb[6].mxu0 %vm373_vm1, %v3549_v33 }
  0x7a   : > { %2693 = vmatmul.mubr.msk.f32.vlgmr.msra.gmra.mrb[0].mxu1 %vm373_vm1, %v908_v42  ;;  %2808 = vmatprep.mubr.msk.f32.mxu0 %vm373_vm1, %v3557_v19 }
  0x7b   : > { %2695 = vmatprep.mubr.msk.f32.mxu1 %vm373_vm1, %v3190_v18  ;;  %2847 = vmatpush3.msk.msra.mxu1 %vm422_vm0, %v3124_v1  ;;  %v1728_v1 = vrot.slane %v3419_v21, 2  ;;  %v1727_v18 = vsel %vm1488_vm3, %v1725_v44, %v1726_v60 }
  0x7d   : > { %2809 = vmatmul.mubr.msk.f32.gmra.mrb[8].mxu0 %vm373_vm1, %v3570_v15 }
  0x7e   : > { %2696 = vmatmul.mubr.msk.f32.gmra.mrb[2].mxu1 %vm373_vm1, %v3210_v23  ;;  %2811 = vmatprep.mubr.msk.f32.mxu0 %vm373_vm1, %v3576_v8  ;;  %v1729_v23 = vsel %vm1488_vm3, %v1726_v60, %v1728_v1 }
  0x7f   : > { %2698 = vmatprep.mubr.msk.f32.mxu1 %vm373_vm1, %v3213_v24  ;;  %v1898_v24 = vrot.slane %v3422_v27, 2 }
  0x81   : > { %2812 = vmatmul.mubr.msk.f32.gmra.mrb[10].mxu0 %vm373_vm1, %v3587_v17 }
  0x82   : > { %2699 = vmatmul.mubr.msk.f32.gmra.mrb[4].mxu1 %vm373_vm1, %v3232_v28  ;;  %2814 = vmatprep.mubr.msk.f32.mxu0 %vm373_vm1, %v3593_v58  ;;  %v1900_v28 = vsel %vm1488_vm3, %v1898_v24, %v1899_v51 }
  0x83   : > { %2701 = vmatprep.mubr.msk.f32.mxu1 %vm373_vm1, %v3240_v30 }
  0x85   : > { %2815 = vmatmul.mubr.msk.f32.gmra.mrb[12].mxu0 %vm373_vm1, %v3602_v26 }
  0x86   : > { %2702 = vmatmul.mubr.msk.f32.gmra.mrb[6].mxu1 %vm373_vm1, %v3259_v34  ;;  %2817 = vmatprep.mubr.msk.f32.mxu0 %vm373_vm1, %v1727_v18 }
  0x87   : > { %2704 = vmatprep.mubr.msk.f32.mxu1 %vm373_vm1, %v3265_v36 }
  0x89   : > { %2818 = vmatmul.mubr.msk.f32.gmra.mrb[14].mxu0 %vm373_vm1, %v1729_v23 }
  0x8a   : > { %2705 = vmatmul.mubr.msk.f32.gmra.mrb[8].mxu1 %vm373_vm1, %v3277_v38  ;;  %2822 = vmatprep.mubr.msk.f32.mxu0 %vm373_vm1, %v3503_v46 }
  0x8b   : > { %2707 = vmatprep.mubr.msk.f32.mxu1 %vm373_vm1, %v3356_v55 }
  0x8d   : > { %2823 = vmatmul.mubr.msk.f32.vlgmr.msra.gmra.mrb[0].mxu0 %vm373_vm1, %v3515_v16 }
  0x8e   : > { %2708 = vmatmul.mubr.msk.f32.gmra.mrb[10].mxu1 %vm373_vm1, %v3378_v61  ;;  %2825 = vmatprep.mubr.msk.f32.mxu0 %vm373_vm1, %v3521_v56 }
  0x8f   : > { %2710 = vmatprep.mubr.msk.f32.mxu1 %vm373_vm1, %v3387_v0 }
  0x91   : > { %2826 = vmatmul.mubr.msk.f32.gmra.mrb[2].mxu0 %vm373_vm1, %v3532_v22 }
  0x92   : > { %2711 = vmatmul.mubr.msk.f32.gmra.mrb[12].mxu1 %vm373_vm1, %v3406_v12  ;;  %2828 = vmatprep.mubr.msk.f32.mxu0 %vm373_vm1, %v3538_v3 }
  0x93   : > { %2713 = vmatprep.mubr.msk.f32.mxu1 %vm373_vm1, %v3416_v20 }
  0x95   : > { %2829 = vmatmul.mubr.msk.f32.gmra.mrb[4].mxu0 %vm373_vm1, %v3549_v33 }
  0x96   : > { %2714 = vmatmul.mubr.msk.f32.gmra.mrb[14].mxu1 %vm373_vm1, %v3433_v11  ;;  %2831 = vmatprep.mubr.msk.f32.mxu0 %vm373_vm1, %v3557_v19 }
  0x97   : > { %2730 = vmatprep.mubr.msk.f32.mxu1 %vm373_vm1, %v3356_v55 }
  0x99   : > { %2832 = vmatmul.mubr.msk.f32.gmra.mrb[6].mxu0 %vm373_vm1, %v3570_v15 }
  0x9a   : > { %2731 = vmatmul.mubr.msk.f32.vlgmr.msra.gmra.mrb[8].mxu1 %vm373_vm1, %v3378_v61  ;;  %2834 = vmatprep.mubr.msk.f32.mxu0 %vm373_vm1, %v3576_v8  ;;  %v3750_v61 = vld [vmem:[%s3823_s3] ss:$0 sm:$0xff] }
  0x9b   : > { %2733 = vmatprep.mubr.msk.f32.mxu1 %vm373_vm1, %v3387_v0 }
  0x9d   : > { %2835 = vmatmul.mubr.msk.f32.gmra.mrb[8].mxu0 %vm373_vm1, %v3587_v17 }
  0x9e   : > { %2734 = vmatmul.mubr.msk.f32.gmra.mrb[10].mxu1 %vm373_vm1, %v3406_v12  ;;  %2837 = vmatprep.mubr.msk.f32.mxu0 %vm373_vm1, %v3593_v58 }
  0x9f   : > { %2736 = vmatprep.mubr.msk.f32.mxu1 %vm373_vm1, %v3416_v20 }
  0xa1   : > { %2838 = vmatmul.mubr.msk.f32.gmra.mrb[10].mxu0 %vm373_vm1, %v3602_v26 }
  0xa2   : > { %2737 = vmatmul.mubr.msk.f32.gmra.mrb[12].mxu1 %vm373_vm1, %v3433_v11  ;;  %2840 = vmatprep.mubr.msk.f32.mxu0 %vm373_vm1, %v1727_v18 }
  0xa3   : > { %2739 = vmatprep.mubr.msk.f32.mxu1 %vm373_vm1, %v3439_v31 }
  0xa5   : > { %2841 = vmatmul.mubr.msk.f32.gmra.mrb[12].mxu0 %vm373_vm1, %v1729_v23 }
  0xa6   : > { %2740 = vmatmul.mubr.msk.f32.gmra.mrb[14].mxu1 %vm373_vm1, %v3450_v45  ;;  %2843 = vmatprep.mubr.msk.f32.mxu0 %vm373_vm1, %v1900_v28 }
  0xa9   : > { %2844 = vmatmul.mubr.msk.f32.gmra.mrb[14].mxu0 %vm373_vm1, %v3366_v59 }
 0x14d   : > { %v2694_v30 = vpop.f32.mrb[0].mxu1 }
 0x14e   : > { %v1045_v34 = vpop.f32.mrb[1].mxu1 }
 0x151   : > { %v2697_v36 = vpop.f32.mrb[2].mxu1 }
 0x152   : > { %v1055_v38 = vpop.f32.mrb[3].mxu1 }
 0x155   : > { %v2700_v48 = vpop.f32.mrb[4].mxu1 }
 0x156   : > { %v1065_v49 = vpop.f32.mrb[5].mxu1 }
 0x159   : > { %v2703_v51 = vpop.f32.mrb[6].mxu1 }
 0x15a   : > { %v1075_v54 = vpop.f32.mrb[7].mxu1 }
 0x160   : > { %v2824_v55 = vpop.f32.mrb[0].mxu0 }
 0x161   : > { %v2848_v59 = vadd.f32 %v2824_v55, %v2694_v30  ;;  %v1976_v63 = vpop.f32.mrb[1].mxu0 }
 0x162   : > { %v2849_v0 = vadd.f32 %v1976_v63, %v1045_v34 }
 0x163   : > { %v2079_v7 = vadd.f32 %v2848_v59, %v3750_v61 }
 0x164   : > { %v2078_v12 = vadd.f32 %v2849_v0, %v3750_v61  ;;  %v2827_v20 = vpop.f32.mrb[2].mxu0 }
 0x165   : > { %v2095_v21 = vmax.f32 %v2079_v7, 0.0  ;;  %v2850_v27 = vadd.f32 %v2827_v20, %v2697_v36  ;;  %v1986_v11 = vpop.f32.mrb[3].mxu0 }
 0x166   : > { %v2094_v31 = vmax.f32 %v2078_v12, 0.0  ;;  %v2851_v45 = vadd.f32 %v1986_v11, %v1055_v38 }
 0x167   : > { %2111 = vst.msk [vmem:[%s3756_s27 + $0x8] sm:$0xff] %vm373_vm1, %v2095_v21  ;;  %v2081_v57 = vadd.f32 %v2850_v27, %v3750_v61 }
 0x168   : > { %2110 = vst.msk [vmem:[%s3756_s27] sm:$0xff] %vm373_vm1, %v2094_v31  ;;  %v2080_v5 = vadd.f32 %v2851_v45, %v3750_v61  ;;  %v2830_v32 = vpop.f32.mrb[4].mxu0 }
 0x169   : > { %v2097_v9 = vmax.f32 %v2081_v57, 0.0  ;;  %v2852_v46 = vadd.f32 %v2830_v32, %v2700_v48  ;;  %v1996_v52 = vpop.f32.mrb[5].mxu0 }
 0x16a   : > { %v2096_v43 = vmax.f32 %v2080_v5, 0.0  ;;  %v2853_v16 = vadd.f32 %v1996_v52, %v1065_v49 }
 0x16b   : > { %2113 = vst.msk [vmem:[%s3756_s27 + $0x18] sm:$0xff] %vm373_vm1, %v2097_v9  ;;  %v2083_v53 = vadd.f32 %v2852_v46, %v3750_v61 }
 0x16c   : > { %2112 = vst.msk [vmem:[%s3756_s27 + $0x10] sm:$0xff] %vm373_vm1, %v2096_v43  ;;  %v2082_v56 = vadd.f32 %v2853_v16, %v3750_v61  ;;  %v2833_v50 = vpop.f32.mrb[6].mxu0 }
 0x16d   : > { %v2099_v62 = vmax.f32 %v2083_v53, 0.0  ;;  %v2854_v22 = vadd.f32 %v2833_v50, %v2703_v51  ;;  %v2732_v2 = vpop.f32.mrb[8].mxu1  ;;  %v2006_v3 = vpop.f32.mrb[7].mxu0 }
 0x16e   : > { %v2098_v13 = vmax.f32 %v2082_v56, 0.0  ;;  %v2855_v14 = vadd.f32 %v2006_v3, %v1075_v54  ;;  %v1259_v33 = vpop.f32.mrb[9].mxu1 }
 0x16f   : > { %2115 = vst.msk [vmem:[%s3756_s27 + $0x28] sm:$0xff] %vm373_vm1, %v2099_v62  ;;  %v2085_v6 = vadd.f32 %v2854_v22, %v3750_v61 }
 0x170   : > { %2114 = vst.msk [vmem:[%s3756_s27 + $0x20] sm:$0xff] %vm373_vm1, %v2098_v13  ;;  %v2084_v19 = vadd.f32 %v2855_v14, %v3750_v61  ;;  %v2836_v29 = vpop.f32.mrb[8].mxu0 }
 0x171   : > { %v2101_v10 = vmax.f32 %v2085_v6, 0.0  ;;  %v2856_v15 = vadd.f32 %v2836_v29, %v2732_v2  ;;  %v2735_v47 = vpop.f32.mrb[10].mxu1  ;;  %v2016_v8 = vpop.f32.mrb[9].mxu0 }
 0x172   : > { %v2100_v4 = vmax.f32 %v2084_v19, 0.0  ;;  %v2857_v35 = vadd.f32 %v2016_v8, %v1259_v33  ;;  %v1269_v17 = vpop.f32.mrb[11].mxu1 }
 0x173   : > { %2117 = vst.msk [vmem:[%s3756_s27 + $0x38] sm:$0xff] %vm373_vm1, %v2101_v10  ;;  %v2087_v25 = vadd.f32 %v2856_v15, %v3750_v61 }
 0x174   : > { %2116 = vst.msk [vmem:[%s3756_s27 + $0x30] sm:$0xff] %vm373_vm1, %v2100_v4  ;;  %v2086_v58 = vadd.f32 %v2857_v35, %v3750_v61  ;;  %v2839_v26 = vpop.f32.mrb[10].mxu0 }
 0x175   : > { %v2103_v37 = vmax.f32 %v2087_v25, 0.0  ;;  %v2858_v39 = vadd.f32 %v2839_v26, %v2735_v47  ;;  %v2738_v40 = vpop.f32.mrb[12].mxu1  ;;  %v2026_v41 = vpop.f32.mrb[11].mxu0 }
 0x176   : > { %v2102_v42 = vmax.f32 %v2086_v58, 0.0  ;;  %v2859_v44 = vadd.f32 %v2026_v41, %v1269_v17  ;;  %v1279_v60 = vpop.f32.mrb[13].mxu1 }
 0x177   : > { %2119 = vst.msk [vmem:[%s3756_s27 + $0x48] sm:$0xff] %vm373_vm1, %v2103_v37  ;;  %v2089_v1 = vadd.f32 %v2858_v39, %v3750_v61 }
 0x178   : > { %2118 = vst.msk [vmem:[%s3756_s27 + $0x40] sm:$0xff] %vm373_vm1, %v2102_v42  ;;  %v2088_v18 = vadd.f32 %v2859_v44, %v3750_v61  ;;  %v2842_v23 = vpop.f32.mrb[12].mxu0 }
 0x179   : > { %v2105_v24 = vmax.f32 %v2089_v1, 0.0  ;;  %v2860_v28 = vadd.f32 %v2842_v23, %v2738_v40  ;;  %v2741_v30 = vpop.f32.mrb[14].mxu1  ;;  %v2036_v34 = vpop.f32.mrb[13].mxu0 }
 0x17a   : > { %v2104_v36 = vmax.f32 %v2088_v18, 0.0  ;;  %v2861_v38 = vadd.f32 %v2036_v34, %v1279_v60  ;;  %v1289_v48 = vpop.f32.mrb[15].mxu1 }
 0x17b   : > { %2121 = vst.msk [vmem:[%s3756_s27 + $0x58] sm:$0xff] %vm373_vm1, %v2105_v24  ;;  %v2091_v49 = vadd.f32 %v2860_v28, %v3750_v61 }
 0x17c   : > { %2120 = vst.msk [vmem:[%s3756_s27 + $0x50] sm:$0xff] %vm373_vm1, %v2104_v36  ;;  %v2090_v51 = vadd.f32 %v2861_v38, %v3750_v61  ;;  %v2845_v54 = vpop.f32.mrb[14].mxu0 }
 0x17d   : > { %v2107_v55 = vmax.f32 %v2091_v49, 0.0  ;;  %v2862_v59 = vadd.f32 %v2845_v54, %v2741_v30  ;;  %v2046_v63 = vpop.f32.mrb[15].mxu0 }
 0x17e   : > { %v2106_v0 = vmax.f32 %v2090_v51, 0.0  ;;  %v2863_v7 = vadd.f32 %v2046_v63, %v1289_v48 }
 0x17f   : > { %2123 = vst.msk [vmem:[%s3756_s27 + $0x68] sm:$0xff] %vm373_vm1, %v2107_v55  ;;  %v2093_v12 = vadd.f32 %v2862_v59, %v3750_v61 }
 0x180   : > { %2122 = vst.msk [vmem:[%s3756_s27 + $0x60] sm:$0xff] %vm373_vm1, %v2106_v0  ;;  %v2092_v20 = vadd.f32 %v2863_v7, %v3750_v61 }
 0x181   : > { %v2109_v21 = vmax.f32 %v2093_v12, 0.0 }
 0x182   : > { %v2108_v27 = vmax.f32 %v2092_v20, 0.0 }
 0x183   : > { %2125 = vst.msk [vmem:[%s3756_s27 + $0x78] sm:$0xff] %vm373_vm1, %v2109_v21 }
 0x184   : > { %2124 = vst.msk [vmem:[%s3756_s27 + $0x70] sm:$0xff] %vm373_vm1, %v2108_v27 }
 0x185 PF: > { %s14_s19 = sadd.s32 1, %s3057_s19   ;;  %s3826_s15 = smov %s3049_s17 }
 0x186   : > { %p11_p9 = scmp.ge.s32.totalorder %s14_s19, 6   ;;  %s3827_s16 = smov %s3053_s18 }
 0x187   : > { %s3828_s17 = smov %s3831_s20  ;;  %s3829_s18 = smov %s3835_s21 }
 0x188   :  { %13 = sbr.rel (!%p11_p9) target bundleno = 3 (0x3), region = 75 }

</bundles_post_ra>
